<compile_context>
chip_gen: v7x
topology: tpu7x:2x2x1
jax: 0.10.0
libtpu: 0.0.40
codegen_flags: <defaults>
</compile_context>

<pallas_src>
import functools

import jax
import jax.numpy as jnp
from jax.experimental import pallas as pl
from jax.experimental.pallas import tpu as pltpu


def _round_up(x, m):
    return ((x + m - 1) // m) * m


def _actor_kernel(max_action):
    """Kernel closure with max_action baked in as a compile-time constant.

    NOTE: each distinct max_action value triggers a recompile; fine for a fixed
    environment (documented footgun, not a numerics issue).
    """

    def kernel(x_ref, w1_ref, b1_ref, w2_ref, b2_ref, w3_ref, b3_ref, o_ref):
        # Layer 1: f32 state block cast to bf16 at the dot input (in-kernel, so
        # no extra HBM pass), MXU matmul with f32 accumulation, bias+ReLU in f32.
        x = x_ref[...].astype(jnp.bfloat16)
        h1 = jnp.dot(x, w1_ref[...], preferred_element_type=jnp.float32)
        h1 = jnp.maximum(h1 + b1_ref[...], 0.0)

        # Layer 2: cast activations to bf16 only at the dot input.
        h2 = jnp.dot(h1.astype(jnp.bfloat16), w2_ref[...],
                     preferred_element_type=jnp.float32)
        h2 = jnp.maximum(h2 + b2_ref[...], 0.0)

        # Layer 3: Linear (out-features zero-padded to 128 lanes) + tanh, scaled.
        h3 = jnp.dot(h2.astype(jnp.bfloat16), w3_ref[...],
                     preferred_element_type=jnp.float32)
        o_ref[...] = (max_action * jnp.tanh(h3 + b3_ref[...])).astype(o_ref.dtype)

    return kernel


@functools.partial(jax.jit, static_argnames=("max_action", "block_b"))
def actor_forward(state, params, max_action, *, block_b=2048):
    """state: (B, state_dim) f32. params: w1,b1,w2,b2,w3,b3 with weights (in, out)."""
    # bf16 MXU operands for the weights; biases stay f32 for the elementwise path.
    w1 = params["w1"].astype(jnp.bfloat16)
    w2 = params["w2"].astype(jnp.bfloat16)
    w3 = params["w3"].astype(jnp.bfloat16)
    b1 = params["b1"].astype(jnp.float32)
    b2 = params["b2"].astype(jnp.float32)
    b3 = params["b3"].astype(jnp.float32)

    B, state_dim = state.shape
    action_dim = w3.shape[1]

    # Lane-dense output: pad layer-3 out-features to a multiple of 128 so the
    # output block stores full 128-lane vregs (unmasked vst). The MXU pads N
    # internally anyway, so the matmul cost is unchanged; padded bias cols are 0.
    n_pad = _round_up(action_dim, 128)
    if n_pad != action_dim:
        w3 = jnp.pad(w3, ((0, 0), (0, n_pad - action_dim)))
        b3 = jnp.pad(b3, ((0, 0), (0, n_pad - action_dim)))

    # Batch tile: multiple of 16 (bf16 sublane packing), capped at block_b, and
    # also capped so the grid has >= 2 balanced steps (megacore on v7x).
    tb = max(16, min(block_b, _round_up(pl.cdiv(B, 2), 16)))
    grid = (pl.cdiv(B, tb),)  # last block may be partial; rows are independent.

    # Streamed blocks: state/output advance along the batch axis.
    state_spec = pl.BlockSpec((tb, state_dim), lambda i: (i, 0))
    out_spec = pl.BlockSpec((tb, n_pad), lambda i: (i, 0))
    # Resident blocks: constant block index -> weights/biases DMA'd once.
    resident = lambda shape: pl.BlockSpec(shape, lambda i: (0, 0))

    out = pl.pallas_call(
        _actor_kernel(float(max_action)),
        out_shape=jax.ShapeDtypeStruct((B, n_pad), jnp.float32),
        grid=grid,
        in_specs=[
            state_spec,
            resident(w1.shape), resident(b1.shape),
            resident(w2.shape), resident(b2.shape),
            resident(w3.shape), resident(b3.shape),
        ],
        out_specs=out_spec,
        compiler_params=pltpu.CompilerParams(
            dimension_semantics=("parallel",),   # megacore sharding on v7x
        ),
    )(state, w1, b1, w2, b2, w3, b3)

    return out[:, :action_dim] if n_pad != action_dim else out


def init_actor_params(key, state_dim, action_dim, hidden_sizes=(128, 128)):
    """Deterministic synthetic init (PyTorch-like fan-in uniform), weights (in, out)."""
    h1, h2 = hidden_sizes
    ks = jax.random.split(key, 6)

    def uniform(k, shape, fan_in):
        bound = 1.0 / jnp.sqrt(fan_in)
        return jax.random.uniform(k, shape, jnp.float32, -bound, bound)

    return {
        "w1": uniform(ks[0], (state_dim, h1), state_dim),
        "b1": uniform(ks[1], (1, h1), state_dim),
        "w2": uniform(ks[2], (h1, h2), h1),
        "b2": uniform(ks[3], (1, h2), h1),
        "w3": uniform(ks[4], (h2, action_dim), h2),
        "b3": uniform(ks[5], (1, action_dim), h2),
    }


def actor_reference(state, params, max_action):
    """Pure-JAX reference with matching bf16-operand / f32-accumulate numerics."""

    def dense(x, w, b):
        y = jnp.dot(x.astype(jnp.bfloat16), w.astype(jnp.bfloat16),
                    preferred_element_type=jnp.float32)
        return y + b.astype(jnp.float32)

    a = jnp.maximum(dense(state, params["w1"], params["b1"]), 0.0)
    a = jnp.maximum(dense(a, params["w2"], params["b2"]), 0.0)
    return max_action * jnp.tanh(dense(a, params["w3"], params["b3"]))


if __name__ == "__main__":
    key = jax.random.PRNGKey(0)
    k_params, k_state = jax.random.split(key)

    batch = 200          # non-multiple of the tile -> exercises the partial-block path
    state_dim = 16
    action_dim = 8
    max_action = 2.0

    params = init_actor_params(k_params, state_dim, action_dim, hidden_sizes=(128, 128))
    state = jax.random.normal(k_state, (batch, state_dim), jnp.float32)

    # With batch=200 the tile is round_up(cdiv(200,2),16)=112 -> grid=(2,), so the
    # multi-step + partial-last-block paths are both exercised.
    out = actor_forward(state, params, max_action)
    out = jax.block_until_ready(out)

    ref = actor_reference(state, params, max_action)
    assert out.shape == (batch, action_dim)
    assert bool(jnp.all(jnp.isfinite(out))), "non-finite output"
    assert jnp.allclose(out, ref, atol=2e-3, rtol=2e-3), "mismatch vs reference"

    print("KERNEL_OK")
</pallas_src>

<mosaic_0001>
module attributes {stable_mosaic.version = 11 : i64} {
  func.func @kernel(%arg0: i32, %arg1: memref<112x16xf32, #tpu.memory_space<vmem>>, %arg2: memref<16x128xbf16, #tpu.memory_space<vmem>>, %arg3: memref<1x128xf32, #tpu.memory_space<vmem>>, %arg4: memref<128x128xbf16, #tpu.memory_space<vmem>>, %arg5: memref<1x128xf32, #tpu.memory_space<vmem>>, %arg6: memref<128x128xbf16, #tpu.memory_space<vmem>>, %arg7: memref<1x128xf32, #tpu.memory_space<vmem>>, %arg8: memref<112x128xf32, #tpu.memory_space<vmem>>) attributes {dimension_semantics = [#tpu.dimension_semantics<parallel>], iteration_bounds = array<i64: 2>, scalar_prefetch = 0 : i64, scratch_operands = 0 : i64, tpu.core_type = #tpu.core_type<tc>, window_params = [{transform_indices = @transform_0, window_bounds = array<i64: 112, 16>}, {pipeline_mode = #tpu.pipeline_mode<synchronous>, transform_indices = @transform_1, window_bounds = array<i64: 16, 128>}, {pipeline_mode = #tpu.pipeline_mode<synchronous>, transform_indices = @transform_2, window_bounds = array<i64: 1, 128>}, {pipeline_mode = #tpu.pipeline_mode<synchronous>, transform_indices = @transform_3, window_bounds = array<i64: 128, 128>}, {pipeline_mode = #tpu.pipeline_mode<synchronous>, transform_indices = @transform_4, window_bounds = array<i64: 1, 128>}, {pipeline_mode = #tpu.pipeline_mode<synchronous>, transform_indices = @transform_5, window_bounds = array<i64: 128, 128>}, {pipeline_mode = #tpu.pipeline_mode<synchronous>, transform_indices = @transform_6, window_bounds = array<i64: 1, 128>}, {transform_indices = @transform_7, window_bounds = array<i64: 112, 128>}]} {
    %c0 = arith.constant 0 : index
    %c0_0 = arith.constant 0 : index
    %0 = vector.load %arg1[%c0, %c0_0] : memref<112x16xf32, #tpu.memory_space<vmem>>, vector<112x16xf32>
    %1 = arith.truncf %0 : vector<112x16xf32> to vector<112x16xbf16>
    %c0_1 = arith.constant 0 : index
    %c0_2 = arith.constant 0 : index
    %2 = vector.load %arg2[%c0_1, %c0_2] : memref<16x128xbf16, #tpu.memory_space<vmem>>, vector<16x128xbf16>
    %cst = arith.constant dense<0.000000e+00> : vector<112x128xf32>
    %3 = tpu.matmul %1, %2, %cst {dimension_numbers = #tpu.dot_dimension_numbers<[1], [0], [0], [1], [0, 0, 1, 1], [], []>} : vector<112x16xbf16>, vector<16x128xbf16>, vector<112x128xf32> -> vector<112x128xf32>
    %c0_3 = arith.constant 0 : index
    %c0_4 = arith.constant 0 : index
    %4 = vector.load %arg3[%c0_3, %c0_4] : memref<1x128xf32, #tpu.memory_space<vmem>>, vector<1x128xf32>
    %5 = vector.broadcast %4 : vector<1x128xf32> to vector<112x128xf32>
    %6 = arith.addf %3, %5 : vector<112x128xf32>
    %cst_5 = arith.constant 0.000000e+00 : f32
    %7 = vector.broadcast %cst_5 : f32 to vector<112x128xf32>
    %8 = arith.maximumf %6, %7 : vector<112x128xf32>
    %9 = arith.truncf %8 : vector<112x128xf32> to vector<112x128xbf16>
    %c0_6 = arith.constant 0 : index
    %c0_7 = arith.constant 0 : index
    %10 = vector.load %arg4[%c0_6, %c0_7] : memref<128x128xbf16, #tpu.memory_space<vmem>>, vector<128x128xbf16>
    %cst_8 = arith.constant dense<0.000000e+00> : vector<112x128xf32>
    %11 = tpu.matmul %9, %10, %cst_8 {dimension_numbers = #tpu.dot_dimension_numbers<[1], [0], [0], [1], [0, 0, 1, 1], [], []>} : vector<112x128xbf16>, vector<128x128xbf16>, vector<112x128xf32> -> vector<112x128xf32>
    %c0_9 = arith.constant 0 : index
    %c0_10 = arith.constant 0 : index
    %12 = vector.load %arg5[%c0_9, %c0_10] : memref<1x128xf32, #tpu.memory_space<vmem>>, vector<1x128xf32>
    %13 = vector.broadcast %12 : vector<1x128xf32> to vector<112x128xf32>
    %14 = arith.addf %11, %13 : vector<112x128xf32>
    %cst_11 = arith.constant 0.000000e+00 : f32
    %15 = vector.broadcast %cst_11 : f32 to vector<112x128xf32>
    %16 = arith.maximumf %14, %15 : vector<112x128xf32>
    %17 = arith.truncf %16 : vector<112x128xf32> to vector<112x128xbf16>
    %c0_12 = arith.constant 0 : index
    %c0_13 = arith.constant 0 : index
    %18 = vector.load %arg6[%c0_12, %c0_13] : memref<128x128xbf16, #tpu.memory_space<vmem>>, vector<128x128xbf16>
    %cst_14 = arith.constant dense<0.000000e+00> : vector<112x128xf32>
    %19 = tpu.matmul %17, %18, %cst_14 {dimension_numbers = #tpu.dot_dimension_numbers<[1], [0], [0], [1], [0, 0, 1, 1], [], []>} : vector<112x128xbf16>, vector<128x128xbf16>, vector<112x128xf32> -> vector<112x128xf32>
    %c0_15 = arith.constant 0 : index
    %c0_16 = arith.constant 0 : index
    %20 = vector.load %arg7[%c0_15, %c0_16] : memref<1x128xf32, #tpu.memory_space<vmem>>, vector<1x128xf32>
    %21 = vector.broadcast %20 : vector<1x128xf32> to vector<112x128xf32>
    %22 = arith.addf %19, %21 : vector<112x128xf32>
    %23 = math.tanh %22 : vector<112x128xf32>
    %cst_17 = arith.constant 2.000000e+00 : f32
    %24 = vector.broadcast %cst_17 : f32 to vector<112x128xf32>
    %25 = arith.mulf %24, %23 : vector<112x128xf32>
    %c0_18 = arith.constant 0 : index
    %c0_19 = arith.constant 0 : index
    %26 = vector.load %arg8[%c0_18, %c0_19] : memref<112x128xf32, #tpu.memory_space<vmem>>, vector<112x128xf32>
    tpu.vector_store %arg8[%c0_18, %c0_19], %25 {strides = array<i32>} : memref<112x128xf32, #tpu.memory_space<vmem>>, vector<112x128xf32>,
    return
  }
  func.func @transform_0(%arg0: i32) -> (i32, i32) {
    %c0_i32 = arith.constant 0 : i32
    %c0_i32_0 = arith.constant 0 : i32
    return %arg0, %c0_i32 : i32, i32
  }
  func.func @transform_1(%arg0: i32) -> (i32, i32) {
    %c0_i32 = arith.constant 0 : i32
    %c0_i32_0 = arith.constant 0 : i32
    %c0_i32_1 = arith.constant 0 : i32
    return %c0_i32, %c0_i32_0 : i32, i32
  }
  func.func @transform_2(%arg0: i32) -> (i32, i32) {
    %c0_i32 = arith.constant 0 : i32
    %c0_i32_0 = arith.constant 0 : i32
    %c0_i32_1 = arith.constant 0 : i32
    return %c0_i32, %c0_i32_0 : i32, i32
  }
  func.func @transform_3(%arg0: i32) -> (i32, i32) {
    %c0_i32 = arith.constant 0 : i32
    %c0_i32_0 = arith.constant 0 : i32
    %c0_i32_1 = arith.constant 0 : i32
    return %c0_i32, %c0_i32_0 : i32, i32
  }
  func.func @transform_4(%arg0: i32) -> (i32, i32) {
    %c0_i32 = arith.constant 0 : i32
    %c0_i32_0 = arith.constant 0 : i32
    %c0_i32_1 = arith.constant 0 : i32
    return %c0_i32, %c0_i32_0 : i32, i32
  }
  func.func @transform_5(%arg0: i32) -> (i32, i32) {
    %c0_i32 = arith.constant 0 : i32
    %c0_i32_0 = arith.constant 0 : i32
    %c0_i32_1 = arith.constant 0 : i32
    return %c0_i32, %c0_i32_0 : i32, i32
  }
  func.func @transform_6(%arg0: i32) -> (i32, i32) {
    %c0_i32 = arith.constant 0 : i32
    %c0_i32_0 = arith.constant 0 : i32
    %c0_i32_1 = arith.constant 0 : i32
    return %c0_i32, %c0_i32_0 : i32, i32
  }
  func.func @transform_7(%arg0: i32) -> (i32, i32) {
    %c0_i32 = arith.constant 0 : i32
    %c0_i32_0 = arith.constant 0 : i32
    return %arg0, %c0_i32 : i32, i32
  }
}

</mosaic_0001>

<bundles_post_ra>
// kernel: actor_forward.1
= control target key start
LH: loop header
LB: loop body
LE: loop exit
PB: predicated region body
PF: predicated region fallthrough
CT: control target
= control target key end

     0   :  { %s1595_s24 = smov 0   ;;  %s1597_s25 = smov 0   ;;  %s1931_s0 = inlined_call_operand.vmem [shape: f32[200,16], index: 0, kind: input, shape index: {}]   ;;  %s1932_s1 = inlined_call_operand.vmem [shape: bf16[16,128], index: 1, kind: input, shape index: {}]   ;;  %s1933_s2 = inlined_call_operand.vmem [shape: f32[1,128], index: 2, kind: input, shape index: {}]   ;;  %s1934_s3 = inlined_call_operand.vmem [shape: bf16[128,128], index: 3, kind: input, shape index: {}]   ;;  %s1935_s4 = inlined_call_operand.vmem [shape: f32[1,128], index: 4, kind: input, shape index: {}]   ;;  %s1936_s5 = inlined_call_operand.vmem [shape: bf16[128,128], index: 5, kind: input, shape index: {}]   ;;  %s1937_s6 = inlined_call_operand.vmem [shape: f32[1,128], index: 6, kind: input, shape index: {}]   ;;  %s1938_s7 = inlined_call_operand.vmem [shape: f32[200,128], index: 7, kind: output, shape index: {}]  }
   0x1   :  { %s1599_s26 = smov 0  }
   0x2 LB: > { %s1608_s27 = sadd.s32 4294967295, %s1519_s26   ;;  %s1610_s28 = sadd.s32 1, %s1519_s26   ;;  %s1519_s26 = sphi %s1599_s26, %s1945_s26   ;;  %s1515_s25 = sphi %s1597_s25, %s1944_s25   ;;  %s1511_s24 = sphi %s1595_s24, %s1943_s24  }
   0x3   : > { %s173_s29 = ssub.s32 %s1519_s26, %s1610_s28  ;;  %s176_s30 = sadd.s32 1, %s1515_s25 }
   0x4   : > { %p174_p0 = scmp.eq.s32.totalorder %s173_s29, 0  ;;  %p186_p1 = scmp.ne.s32.totalorder %s1515_s25, %s1511_s24 }
   0x5   : > { %p187_p2 = scmp.eq.s32.totalorder %s1608_s27, 1  ;;  %p1124_p3 = scmp.ge.s32.totalorder %s1519_s26, 1 }
   0x6   : > { %s1618_s8 = scalar_select %p174_p0, %s1515_s25, %s176_s30  }
   0x7   : > { %p1620_p4 = por %p187_p2, %p186_p1  ;;  %p246_p5 = scmp.lt.s32.totalorder %s1519_s26, 3 }
   0x9   : > { %p247_p6 = pnand %p1124_p3, %p246_p5 }
   0xa   : > { %v1416_v0 = vld [vmem:[%s1932_s1] sm:$0xff] (!%p247_p6)   ;;  %v1553_v1 = vmov (!%p247_p6), 0.0   ;;  %s1629_s12 = smul.u32 (!%p247_p6), 14, %s1608_s27  ;;  %vm1554_vm0 = vmmov (!%p247_p6), 0   ;;  %vm337_vm1 = vcmask (!%p247_p6), 130048   ;;  %v1418_v13 = vld [vmem:[%s1934_s3 + $0x8] sm:$0xff] (!%p247_p6)  }
   0xb   : > { %250 = sbr.rel (%p247_p6) target bundleno = 804 (0x324), region = 48  ;;  %1204 = vmatprep.subr.bf16.mxu0 (!%p247_p6), %v1553_v1  ;;  %1322 = vmatprep.subr.bf16.mxu1 (!%p247_p6), %v1553_v1  ;;  %v1417_v7 = vld [vmem:[%s1934_s3] sm:$0xff] (!%p247_p6)   ;;  %v1419_v16 = vld [vmem:[%s1934_s3 + $0x10] sm:$0xff] (!%p247_p6)   ;;  %v1420_v22 = vld [vmem:[%s1934_s3 + $0x18] sm:$0xff] (!%p247_p6)   ;;  %s278_s26 = sand.u32 (!%p247_p6), 1, %s1511_s24  }
   0xc   : > { %1205 = vmatpush3.bf16.msra.mxu0 (!%p247_p6), %v1416_v0  ;;  %1206 = vmatprep.mubr.msk.bf16.mxu0 (!%p247_p6), %vm1554_vm0, %v1553_v1  ;;  %p286_p7 = scmp.lt.s32.totalorder (!%p247_p6), %s1629_s12, 24  ;;  %v1421_v24 = vld [vmem:[%s1934_s3 + $0x20] sm:$0xff] (!%p247_p6)   ;;  %v1422_v28 = vld [vmem:[%s1934_s3 + $0x28] sm:$0xff] (!%p247_p6)   ;;  %v1423_v29 = vld [vmem:[%s1934_s3 + $0x30] sm:$0xff] (!%p247_p6)   ;;  %s1324_s29 = smul.u32 (!%p247_p6), 112, %s278_s26 }
   0xd   : > { %1323 = vmatpush3.bf16.msra.mxu1 (!%p247_p6), %v1416_v0  ;;  %1222 = vmatprep.mubr.msk.bf16.mxu1 (!%p247_p6), %vm1554_vm0, %v1553_v1  ;;  %v1424_v30 = vld [vmem:[%s1934_s3 + $0x38] sm:$0xff] (!%p247_p6)   ;;  %v1425_v31 = vld [vmem:[%s1936_s5] sm:$0xff] (!%p247_p6)   ;;  %v1426_v32 = vld [vmem:[%s1936_s5 + $0x8] sm:$0xff] (!%p247_p6)  }
   0xe   : > { %1234 = vmatprep.subr.bf16.mxu1 (!%p247_p6), %v1553_v1  ;;  %1278 = vmatprep.subr.bf16.mxu0 (!%p247_p6), %v1553_v1  ;;  %v1427_v33 = vld [vmem:[%s1936_s5 + $0x10] sm:$0xff] (!%p247_p6)   ;;  %v1428_v34 = vld [vmem:[%s1936_s5 + $0x18] sm:$0xff] (!%p247_p6)   ;;  %v1429_v35 = vld [vmem:[%s1936_s5 + $0x20] sm:$0xff] (!%p247_p6)   ;;  %s1814_s30 = scalar_lea.vmem (!%p247_p6), [#allocation2], %s1324_s29  }
   0xf   : > { %v1430_v36 = vld [vmem:[%s1936_s5 + $0x28] sm:$0xff] (!%p247_p6)   ;;  %v1738_v37 = vld [vmem:[%s1933_s2] ss:$0 sm:$0xff] (!%p247_p6) }
  0x12   : > { %s287_s13 = scalar_select %p286_p7, %s1629_s12, 24 }
  0x13   : > { %s860_s24 = ssub.s32 (%p1620_p4), 25, %s1629_s12  ;;  %s1165_s10 = smul.u32 (%p1620_p4), 112, %s1608_s27 }
  0x14   : > { %s1125_s14 = sshll.u32 %s287_s13, 3  ;;  %p861_p8 = scmp.lt.s32.totalorder (%p1620_p4), %s860_s24, 14 }
  0x15   : > { %s1643_s17 = scalar_lea.vmem %s1931_s0, %s1125_s14  ;;  %s1847_s14 = scalar_lea.vmem (%p1620_p4), %s1938_s7, %s1165_s10  }
  0x16   : > { %v301_v2 = vld [vmem:[%s1643_s17] sm:$0xff]  ;;  %v302_v3 = vld [vmem:[%s1643_s17 + $0x8] sm:$0xff]  ;;  %v303_v8 = vld [vmem:[%s1643_s17 + $0x10] sm:$0xff] }
  0x17   : > { %v315_v4 = vpack.c.bf16 %v302_v3, %v301_v2  ;;  %v309_v5 = vld [vmem:[%s1643_s17 + $0x40] sm:$0xff]  ;;  %v310_v6 = vld [vmem:[%s1643_s17 + $0x48] sm:$0xff]  ;;  %v304_v9 = vld [vmem:[%s1643_s17 + $0x18] sm:$0xff] }
  0x18   : > { %v319_v10 = vpack.c.bf16 %v310_v6, %v309_v5  ;;  %v311_v11 = vld [vmem:[%s1643_s17 + $0x50] sm:$0xff]  ;;  %v312_v12 = vld [vmem:[%s1643_s17 + $0x58] sm:$0xff]  ;;  %v316_v14 = vpack.c.bf16 %v304_v9, %v303_v8  ;;  %v305_v17 = vld [vmem:[%s1643_s17 + $0x20] sm:$0xff] }
  0x19   : > { %1207 = vmatmul.mubr.msk.bf16.vlgmr.msra.gmra.mrb[0].mxu0 %vm337_vm1, %v315_v4  ;;  %v320_v15 = vpack.c.bf16 %v312_v12, %v311_v11  ;;  %v306_v18 = vld [vmem:[%s1643_s17 + $0x28] sm:$0xff]  ;;  %v313_v20 = vld [vmem:[%s1643_s17 + $0x60] sm:$0xff]  ;;  %v307_v25 = vld [vmem:[%s1643_s17 + $0x30] sm:$0xff] }
  0x1a   : > { %1210 = vmatprep.mubr.msk.bf16.mxu0 %vm1554_vm0, %v1553_v1  ;;  %1223 = vmatmul.mubr.msk.bf16.vlgmr.msra.gmra.mrb[0].mxu1 %vm337_vm1, %v319_v10  ;;  %v317_v19 = vpack.c.bf16 %v306_v18, %v305_v17  ;;  %v314_v21 = vld [vmem:[%s1643_s17 + $0x68] sm:$0xff]  ;;  %v308_v26 = vld [vmem:[%s1643_s17 + $0x38] sm:$0xff] }
  0x1b   : > { %1226 = vmatprep.mubr.msk.bf16.mxu1 %vm1554_vm0, %v1553_v1  ;;  %1235 = vmatpush3.bf16.msra.mxu1 %v1417_v7  ;;  %v321_v23 = vpack.c.bf16 %v314_v21, %v313_v20  ;;  %v318_v27 = vpack.c.bf16 %v308_v26, %v307_v25 }
  0x1c   : > { %1236 = vmatprep.subr.bf16.mxu1 %v1553_v1  ;;  %1279 = vmatpush3.bf16.msra.mxu0 %v1425_v31 }
  0x1d   : > { %1280 = vmatprep.subr.bf16.mxu0 %v1553_v1 }
  0x1f   : > { %1237 = vmatpush3.bf16.msra.mxu1 %v1418_v13 }
  0x20   : > { %1238 = vmatprep.subr.bf16.mxu1 %v1553_v1  ;;  %1281 = vmatpush3.bf16.msra.mxu0 %v1426_v32 }
  0x21   : > { %1211 = vmatmul.mubr.msk.bf16.gmra.mrb[4].mxu0 %vm337_vm1, %v316_v14  ;;  %1282 = vmatprep.subr.bf16.mxu0 %v1553_v1 }
  0x22   : > { %1214 = vmatprep.mubr.msk.bf16.mxu0 %vm1554_vm0, %v1553_v1  ;;  %1227 = vmatmul.mubr.msk.bf16.gmra.mrb[4].mxu1 %vm337_vm1, %v320_v15 }
  0x23   : > { %1230 = vmatprep.mubr.msk.bf16.mxu1 %vm1554_vm0, %v1553_v1  ;;  %1239 = vmatpush3.bf16.msra.mxu1 %v1419_v16 }
  0x24   : > { %1240 = vmatprep.subr.bf16.mxu1 %v1553_v1  ;;  %1283 = vmatpush3.bf16.msra.mxu0 %v1427_v33 }
  0x25   : > { %1284 = vmatprep.subr.bf16.mxu0 %v1553_v1 }
  0x27   : > { %1241 = vmatpush3.bf16.msra.mxu1 %v1420_v22 }
  0x28   : > { %1242 = vmatprep.subr.bf16.mxu1 %v1553_v1  ;;  %1285 = vmatpush3.bf16.msra.mxu0 %v1428_v34 }
  0x29   : > { %1215 = vmatmul.mubr.msk.bf16.gmra.mrb[8].mxu0 %vm337_vm1, %v317_v19  ;;  %1286 = vmatprep.subr.bf16.mxu0 %v1553_v1 }
  0x2a   : > { %1218 = vmatprep.mubr.msk.bf16.mxu0 %vm1554_vm0, %v1553_v1  ;;  %1231 = vmatmul.mubr.msk.bf16.gmra.mrb[8].mxu1 %vm337_vm1, %v321_v23 }
  0x2b   : > { %1243 = vmatpush3.bf16.msra.mxu1 %v1421_v24  ;;  %1250 = vmatprep.mubr.msk.bf16.mxu1 %vm1554_vm0, %v1553_v1 }
  0x2c   : > { %1244 = vmatprep.subr.bf16.mxu1 %v1553_v1  ;;  %1287 = vmatpush3.bf16.msra.mxu0 %v1429_v35 }
  0x2d   : > { %1288 = vmatprep.subr.bf16.mxu0 %v1553_v1 }
  0x2f   : > { %1245 = vmatpush3.bf16.msra.mxu1 %v1422_v28 }
  0x30   : > { %1246 = vmatprep.subr.bf16.mxu1 %v1553_v1  ;;  %1289 = vmatpush3.bf16.msra.mxu0 %v1430_v36 }
  0x31   : > { %1219 = vmatmul.mubr.msk.bf16.gmra.mrb[12].mxu0 %vm337_vm1, %v318_v27  ;;  %1290 = vmatprep.subr.bf16.mxu0 %v1553_v1 }
  0x32   : > { %1294 = vmatprep.mubr.msk.bf16.mxu0 %vm1554_vm0, %v1553_v1 }
  0x33   : > { %1247 = vmatpush3.bf16.msra.mxu1 %v1423_v29 }
  0x34   : > { %1248 = vmatprep.subr.bf16.mxu1 %v1553_v1 }
  0x37   : > { %1249 = vmatpush3.bf16.msra.mxu1 %v1424_v30 }
  0xec   : > { %v393_v38 = vpop.f32.mrb[0].mxu0 }
  0xed   : > { %v394_v39 = vadd.f32 %v1738_v37, %v393_v38  ;;  %v1208_v40 = vpop.f32.mrb[1].mxu0  ;;  %v425_v44 = vpop.f32.mrb[0].mxu1 }
  0xee   : > { %v396_v41 = vpop.f32.mrb[2].mxu0  ;;  %v426_v45 = vadd.f32 %v1738_v37, %v425_v44  ;;  %v1224_v46 = vpop.f32.mrb[1].mxu1  ;;  %v1776_v40 = vld [vmem:[%s1935_s4] ss:$0 sm:$0xff] }
  0xef   : > { %v397_v42 = vadd.f32 %v1738_v37, %v396_v41  ;;  %v1209_v43 = vpop.f32.mrb[3].mxu0  ;;  %v448_v47 = vmax.f32 %v394_v39, 0.0  ;;  %v428_v49 = vpop.f32.mrb[2].mxu1  ;;  %v1432_v39 = vld [vmem:[%s1936_s5 + $0x38] sm:$0xff]  }
  0xf0   : > { %v456_v50 = vmax.f32 %v426_v45, 0.0  ;;  %v429_v51 = vadd.f32 %v1738_v37, %v428_v49  ;;  %v1225_v52 = vpop.f32.mrb[3].mxu1 }
  0xf1   : > { %v449_v48 = vmax.f32 %v397_v42, 0.0 }
  0xf2   : > { %v457_v55 = vmax.f32 %v429_v51, 0.0 }
  0xf3   : > { %v462_v53 = vpack.c.bf16 %v449_v48, %v448_v47 }
  0xf4   : > { %v401_v54 = vpop.f32.mrb[4].mxu0  ;;  %v466_v59 = vpack.c.bf16 %v457_v55, %v456_v50 }
  0xf5   : > { %v402_v56 = vadd.f32 %v1738_v37, %v401_v54  ;;  %v1212_v57 = vpop.f32.mrb[5].mxu0  ;;  %1251 = vmatmul.mubr.bf16.vlgmr.msra.gmra.mrb[12].mxu1 %v462_v53  ;;  %v433_v62 = vpop.f32.mrb[4].mxu1 }
  0xf6   : > { %v404_v58 = vpop.f32.mrb[6].mxu0  ;;  %1254 = vmatprep.mubr.msk.bf16.mxu1 %vm1554_vm0, %v1553_v1  ;;  %v434_v63 = vadd.f32 %v1738_v37, %v433_v62  ;;  %v1228_v0 = vpop.f32.mrb[5].mxu1 }
  0xf7   : > { %v405_v60 = vadd.f32 %v1738_v37, %v404_v58  ;;  %v1213_v61 = vpop.f32.mrb[7].mxu0  ;;  %v450_v2 = vmax.f32 %v402_v56, 0.0  ;;  %v436_v4 = vpop.f32.mrb[6].mxu1 }
  0xf8   : > { %v458_v5 = vmax.f32 %v434_v63, 0.0  ;;  %v437_v6 = vadd.f32 %v1738_v37, %v436_v4  ;;  %v1229_v7 = vpop.f32.mrb[7].mxu1 }
  0xf9   : > { %v451_v3 = vmax.f32 %v405_v60, 0.0 }
  0xfa   : > { %v459_v10 = vmax.f32 %v437_v6, 0.0 }
  0xfb   : > { %v463_v8 = vpack.c.bf16 %v451_v3, %v450_v2 }
  0xfc   : > { %v409_v9 = vpop.f32.mrb[8].mxu0  ;;  %v467_v14 = vpack.c.bf16 %v459_v10, %v458_v5 }
  0xfd   : > { %v410_v11 = vadd.f32 %v1738_v37, %v409_v9  ;;  %v1216_v12 = vpop.f32.mrb[9].mxu0  ;;  %1255 = vmatmul.mubr.bf16.gmra.mrb[16].mxu1 %v463_v8  ;;  %v441_v17 = vpop.f32.mrb[8].mxu1 }
  0xfe   : > { %v412_v13 = vpop.f32.mrb[10].mxu0  ;;  %1258 = vmatprep.mubr.msk.bf16.mxu1 %vm1554_vm0, %v1553_v1  ;;  %v442_v18 = vadd.f32 %v1738_v37, %v441_v17  ;;  %v1232_v19 = vpop.f32.mrb[9].mxu1 }
  0xff   : > { %v413_v15 = vadd.f32 %v1738_v37, %v412_v13  ;;  %v1217_v16 = vpop.f32.mrb[11].mxu0  ;;  %v452_v20 = vmax.f32 %v410_v11, 0.0  ;;  %v444_v22 = vpop.f32.mrb[10].mxu1 }
 0x100   : > { %v460_v23 = vmax.f32 %v442_v18, 0.0  ;;  %v445_v24 = vadd.f32 %v1738_v37, %v444_v22  ;;  %v1233_v25 = vpop.f32.mrb[11].mxu1 }
 0x101   : > { %v453_v21 = vmax.f32 %v413_v15, 0.0 }
 0x102   : > { %v461_v28 = vmax.f32 %v445_v24, 0.0 }
 0x103   : > { %v464_v26 = vpack.c.bf16 %v453_v21, %v452_v20 }
 0x104   : > { %v417_v27 = vpop.f32.mrb[12].mxu0  ;;  %v468_v32 = vpack.c.bf16 %v461_v28, %v460_v23 }
 0x105   : > { %v418_v29 = vadd.f32 %v1738_v37, %v417_v27  ;;  %v1220_v30 = vpop.f32.mrb[13].mxu0  ;;  %1259 = vmatmul.mubr.bf16.gmra.mrb[20].mxu1 %v464_v26 }
 0x106   : > { %v420_v31 = vpop.f32.mrb[14].mxu0  ;;  %1262 = vmatprep.mubr.msk.bf16.mxu1 %vm1554_vm0, %v1553_v1 }
 0x107   : > { %v421_v33 = vadd.f32 %v1738_v37, %v420_v31  ;;  %v1221_v34 = vpop.f32.mrb[15].mxu0  ;;  %v454_v35 = vmax.f32 %v418_v29, 0.0  ;;  %v1431_v37 = vld [vmem:[%s1936_s5 + $0x30] sm:$0xff]  }
 0x108   : > { %1291 = vmatpush3.bf16.msra.mxu0 %v1431_v37 }
 0x109   : > { %v455_v36 = vmax.f32 %v421_v33, 0.0  ;;  %1292 = vmatprep.subr.bf16.mxu0 %v1553_v1 }
 0x10b   : > { %v465_v38 = vpack.c.bf16 %v455_v36, %v454_v35 }
 0x10c   : > { %1293 = vmatpush3.bf16.msra.mxu0 %v1432_v39 }
 0x10d   : > { %1263 = vmatmul.mubr.bf16.gmra.mrb[24].mxu1 %v465_v38 }
 0x10e   : > { %1266 = vmatprep.mubr.msk.bf16.mxu1 %vm1554_vm0, %v1553_v1 }
 0x115   : > { %1267 = vmatmul.mubr.bf16.gmra.mrb[28].mxu1 %v466_v59 }
 0x116   : > { %1270 = vmatprep.mubr.msk.bf16.mxu1 %vm1554_vm0, %v1553_v1 }
 0x11d   : > { %1271 = vmatmul.mubr.bf16.gmra.mrb[32].mxu1 %v467_v14 }
 0x11e   : > { %1274 = vmatprep.mubr.msk.bf16.mxu1 %vm1554_vm0, %v1553_v1 }
 0x125   : > { %1275 = vmatmul.mubr.bf16.gmra.mrb[36].mxu1 %v468_v32 }
 0x1c8   : > { %v574_v41 = vpop.f32.mrb[12].mxu1 }
 0x1c9   : > { %v575_v42 = vadd.f32 %v1776_v40, %v574_v41  ;;  %v1252_v43 = vpop.f32.mrb[13].mxu1 }
 0x1ca   : > { %v577_v44 = vpop.f32.mrb[14].mxu1 }
 0x1cb   : > { %v578_v45 = vadd.f32 %v1776_v40, %v577_v44  ;;  %v1253_v46 = vpop.f32.mrb[15].mxu1  ;;  %v629_v47 = vmax.f32 %v575_v42, 0.0  ;;  %v1807_v42 = vld [vmem:[%s1937_s6] ss:$0 sm:$0xff] }
 0x1cd   : > { %v630_v48 = vmax.f32 %v578_v45, 0.0 }
 0x1cf   : > { %v643_v49 = vpack.c.bf16 %v630_v48, %v629_v47 }
 0x1d0   : > { %v582_v50 = vpop.f32.mrb[16].mxu1 }
 0x1d1   : > { %v583_v51 = vadd.f32 %v1776_v40, %v582_v50  ;;  %v1256_v52 = vpop.f32.mrb[17].mxu1  ;;  %1295 = vmatmul.mubr.bf16.vlgmr.msra.gmra.mrb[16].mxu0 %v643_v49 }
 0x1d2   : > { %v585_v53 = vpop.f32.mrb[18].mxu1  ;;  %1298 = vmatprep.mubr.msk.bf16.mxu0 %vm1554_vm0, %v1553_v1 }
 0x1d3   : > { %v586_v54 = vadd.f32 %v1776_v40, %v585_v53  ;;  %v1257_v55 = vpop.f32.mrb[19].mxu1  ;;  %v631_v56 = vmax.f32 %v583_v51, 0.0 }
 0x1d5   : > { %v632_v57 = vmax.f32 %v586_v54, 0.0 }
 0x1d7   : > { %v644_v58 = vpack.c.bf16 %v632_v57, %v631_v56 }
 0x1d8   : > { %v590_v59 = vpop.f32.mrb[20].mxu1 }
 0x1d9   : > { %v591_v60 = vadd.f32 %v1776_v40, %v590_v59  ;;  %v1260_v61 = vpop.f32.mrb[21].mxu1  ;;  %1299 = vmatmul.mubr.bf16.gmra.mrb[20].mxu0 %v644_v58 }
 0x1da   : > { %v593_v62 = vpop.f32.mrb[22].mxu1  ;;  %1302 = vmatprep.mubr.msk.bf16.mxu0 %vm1554_vm0, %v1553_v1 }
 0x1db   : > { %v594_v63 = vadd.f32 %v1776_v40, %v593_v62  ;;  %v1261_v0 = vpop.f32.mrb[23].mxu1  ;;  %v633_v2 = vmax.f32 %v591_v60, 0.0 }
 0x1dd   : > { %v634_v3 = vmax.f32 %v594_v63, 0.0 }
 0x1df   : > { %v645_v4 = vpack.c.bf16 %v634_v3, %v633_v2 }
 0x1e0   : > { %v598_v5 = vpop.f32.mrb[24].mxu1 }
 0x1e1   : > { %v599_v6 = vadd.f32 %v1776_v40, %v598_v5  ;;  %v1264_v7 = vpop.f32.mrb[25].mxu1  ;;  %1303 = vmatmul.mubr.bf16.gmra.mrb[24].mxu0 %v645_v4 }
 0x1e2   : > { %v601_v8 = vpop.f32.mrb[26].mxu1  ;;  %1306 = vmatprep.mubr.msk.bf16.mxu0 %vm1554_vm0, %v1553_v1 }
 0x1e3   : > { %v602_v9 = vadd.f32 %v1776_v40, %v601_v8  ;;  %v1265_v10 = vpop.f32.mrb[27].mxu1  ;;  %v635_v11 = vmax.f32 %v599_v6, 0.0 }
 0x1e5   : > { %v636_v12 = vmax.f32 %v602_v9, 0.0 }
 0x1e7   : > { %v646_v13 = vpack.c.bf16 %v636_v12, %v635_v11 }
 0x1e8   : > { %v606_v14 = vpop.f32.mrb[28].mxu1 }
 0x1e9   : > { %v607_v15 = vadd.f32 %v1776_v40, %v606_v14  ;;  %v1268_v16 = vpop.f32.mrb[29].mxu1  ;;  %1307 = vmatmul.mubr.bf16.gmra.mrb[28].mxu0 %v646_v13 }
 0x1ea   : > { %v609_v17 = vpop.f32.mrb[30].mxu1  ;;  %1310 = vmatprep.mubr.msk.bf16.mxu0 %vm1554_vm0, %v1553_v1 }
 0x1eb   : > { %v610_v18 = vadd.f32 %v1776_v40, %v609_v17  ;;  %v1269_v19 = vpop.f32.mrb[31].mxu1  ;;  %v637_v20 = vmax.f32 %v607_v15, 0.0 }
 0x1ed   : > { %v638_v21 = vmax.f32 %v610_v18, 0.0 }
 0x1ef   : > { %v647_v22 = vpack.c.bf16 %v638_v21, %v637_v20 }
 0x1f0   : > { %v614_v23 = vpop.f32.mrb[32].mxu1 }
 0x1f1   : > { %v615_v24 = vadd.f32 %v1776_v40, %v614_v23  ;;  %v1272_v25 = vpop.f32.mrb[33].mxu1  ;;  %1311 = vmatmul.mubr.bf16.gmra.mrb[32].mxu0 %v647_v22 }
 0x1f2   : > { %v617_v26 = vpop.f32.mrb[34].mxu1  ;;  %1314 = vmatprep.mubr.msk.bf16.mxu0 %vm1554_vm0, %v1553_v1 }
 0x1f3   : > { %v618_v27 = vadd.f32 %v1776_v40, %v617_v26  ;;  %v1273_v28 = vpop.f32.mrb[35].mxu1  ;;  %v639_v29 = vmax.f32 %v615_v24, 0.0 }
 0x1f5   : > { %v640_v30 = vmax.f32 %v618_v27, 0.0 }
 0x1f7   : > { %v648_v31 = vpack.c.bf16 %v640_v30, %v639_v29 }
 0x1f8   : > { %v622_v32 = vpop.f32.mrb[36].mxu1 }
 0x1f9   : > { %v623_v33 = vadd.f32 %v1776_v40, %v622_v32  ;;  %v1276_v34 = vpop.f32.mrb[37].mxu1  ;;  %1315 = vmatmul.mubr.bf16.gmra.mrb[36].mxu0 %v648_v31 }
 0x1fa   : > { %v625_v35 = vpop.f32.mrb[38].mxu1  ;;  %1318 = vmatprep.mubr.msk.bf16.mxu0 %vm1554_vm0, %v1553_v1 }
 0x1fb   : > { %v626_v36 = vadd.f32 %v1776_v40, %v625_v35  ;;  %v1277_v38 = vpop.f32.mrb[39].mxu1  ;;  %v641_v37 = vmax.f32 %v623_v33, 0.0 }
 0x1fd   : > { %v642_v39 = vmax.f32 %v626_v36, 0.0 }
 0x1ff   : > { %v649_v41 = vpack.c.bf16 %v642_v39, %v641_v37 }
 0x201   : > { %1319 = vmatmul.mubr.bf16.gmra.mrb[40].mxu0 %v649_v41 }
 0x2a4   : > { %v755_v43 = vpop.f32.mrb[16].mxu0 }
 0x2a5   : > { %v756_v44 = vadd.f32 %v1807_v42, %v755_v43  ;;  %v1296_v45 = vpop.f32.mrb[17].mxu0 }
 0x2a6   : > { %v758_v46 = vpop.f32.mrb[18].mxu0 }
 0x2a7   : > { %1433 = vtanh.f32 %v756_v44  ;;  %v759_v1 = vadd.f32 %v1807_v42, %v758_v46  ;;  %v1297_v47 = vpop.f32.mrb[19].mxu0 }
 0x2a9   : > { %1435 = vtanh.f32 %v759_v1 }
 0x2ac   : > { %v763_v40 = vpop.f32.mrb[20].mxu0 }
 0x2ad   : > { %v764_v48 = vadd.f32 %v1807_v42, %v763_v40  ;;  %v1300_v49 = vpop.f32.mrb[21].mxu0 }
 0x2ae   : > { %v766_v50 = vpop.f32.mrb[22].mxu0 }
 0x2af   : > { %1437 = vtanh.f32 %v764_v48  ;;  %v767_v51 = vadd.f32 %v1807_v42, %v766_v50  ;;  %v1301_v52 = vpop.f32.mrb[23].mxu0 }
 0x2b1   : > { %v1434_v53 = vpop.eup %1433  ;;  %1439 = vtanh.f32 %v767_v51 }
 0x2b2   : > { %v824_v54 = vmul.f32 2.0, %v1434_v53 }
 0x2b3   : > { %v1436_v55 = vpop.eup %1435 }
 0x2b4   : > { %838 = vst [vmem:[%s1814_s30] sm:$0xff] %v824_v54  ;;  %v825_v56 = vmul.f32 2.0, %v1436_v55  ;;  %v771_v57 = vpop.f32.mrb[24].mxu0 }
 0x2b5   : > { %v772_v58 = vadd.f32 %v1807_v42, %v771_v57  ;;  %v1304_v59 = vpop.f32.mrb[25].mxu0 }
 0x2b6   : > { %839 = vst [vmem:[%s1814_s30 + $0x8] sm:$0xff] %v825_v56  ;;  %v774_v60 = vpop.f32.mrb[26].mxu0 }
 0x2b7   : > { %1441 = vtanh.f32 %v772_v58  ;;  %v775_v61 = vadd.f32 %v1807_v42, %v774_v60  ;;  %v1305_v62 = vpop.f32.mrb[27].mxu0 }
 0x2b9   : > { %v1438_v63 = vpop.eup %1437  ;;  %1443 = vtanh.f32 %v775_v61 }
 0x2ba   : > { %v826_v0 = vmul.f32 2.0, %v1438_v63 }
 0x2bb   : > { %v1440_v2 = vpop.eup %1439 }
 0x2bc   : > { %840 = vst [vmem:[%s1814_s30 + $0x10] sm:$0xff] %v826_v0  ;;  %v827_v3 = vmul.f32 2.0, %v1440_v2  ;;  %v779_v4 = vpop.f32.mrb[28].mxu0 }
 0x2bd   : > { %v780_v5 = vadd.f32 %v1807_v42, %v779_v4  ;;  %v1308_v6 = vpop.f32.mrb[29].mxu0 }
 0x2be   : > { %841 = vst [vmem:[%s1814_s30 + $0x18] sm:$0xff] %v827_v3  ;;  %v782_v7 = vpop.f32.mrb[30].mxu0 }
 0x2bf   : > { %1445 = vtanh.f32 %v780_v5  ;;  %v783_v8 = vadd.f32 %v1807_v42, %v782_v7  ;;  %v1309_v9 = vpop.f32.mrb[31].mxu0 }
 0x2c1   : > { %v1442_v10 = vpop.eup %1441  ;;  %1447 = vtanh.f32 %v783_v8 }
 0x2c2   : > { %v828_v11 = vmul.f32 2.0, %v1442_v10 }
 0x2c3   : > { %v1444_v12 = vpop.eup %1443 }
 0x2c4   : > { %842 = vst [vmem:[%s1814_s30 + $0x20] sm:$0xff] %v828_v11  ;;  %v829_v13 = vmul.f32 2.0, %v1444_v12  ;;  %v787_v14 = vpop.f32.mrb[32].mxu0 }
 0x2c5   : > { %v788_v15 = vadd.f32 %v1807_v42, %v787_v14  ;;  %v1312_v16 = vpop.f32.mrb[33].mxu0 }
 0x2c6   : > { %843 = vst [vmem:[%s1814_s30 + $0x28] sm:$0xff] %v829_v13  ;;  %v790_v17 = vpop.f32.mrb[34].mxu0 }
 0x2c7   : > { %1449 = vtanh.f32 %v788_v15  ;;  %v791_v18 = vadd.f32 %v1807_v42, %v790_v17  ;;  %v1313_v19 = vpop.f32.mrb[35].mxu0 }
 0x2c9   : > { %v1446_v20 = vpop.eup %1445  ;;  %1451 = vtanh.f32 %v791_v18 }
 0x2ca   : > { %v830_v21 = vmul.f32 2.0, %v1446_v20 }
 0x2cb   : > { %v1448_v22 = vpop.eup %1447 }
 0x2cc   : > { %844 = vst [vmem:[%s1814_s30 + $0x30] sm:$0xff] %v830_v21  ;;  %v831_v23 = vmul.f32 2.0, %v1448_v22  ;;  %v795_v24 = vpop.f32.mrb[36].mxu0 }
 0x2cd   : > { %v796_v25 = vadd.f32 %v1807_v42, %v795_v24  ;;  %v1316_v26 = vpop.f32.mrb[37].mxu0 }
 0x2ce   : > { %845 = vst [vmem:[%s1814_s30 + $0x38] sm:$0xff] %v831_v23  ;;  %v798_v27 = vpop.f32.mrb[38].mxu0 }
 0x2cf   : > { %1453 = vtanh.f32 %v796_v25  ;;  %v799_v28 = vadd.f32 %v1807_v42, %v798_v27  ;;  %v1317_v29 = vpop.f32.mrb[39].mxu0 }
 0x2d1   : > { %v1450_v30 = vpop.eup %1449  ;;  %1455 = vtanh.f32 %v799_v28 }
 0x2d2   : > { %v832_v31 = vmul.f32 2.0, %v1450_v30 }
 0x2d3   : > { %v1452_v32 = vpop.eup %1451 }
 0x2d4   : > { %846 = vst [vmem:[%s1814_s30 + $0x40] sm:$0xff] %v832_v31  ;;  %v833_v33 = vmul.f32 2.0, %v1452_v32  ;;  %v803_v34 = vpop.f32.mrb[40].mxu0 }
 0x2d5   : > { %v804_v35 = vadd.f32 %v1807_v42, %v803_v34  ;;  %v1320_v36 = vpop.f32.mrb[41].mxu0 }
 0x2d6   : > { %847 = vst [vmem:[%s1814_s30 + $0x48] sm:$0xff] %v833_v33  ;;  %v806_v38 = vpop.f32.mrb[42].mxu0 }
 0x2d7   : > { %1457 = vtanh.f32 %v804_v35  ;;  %v807_v37 = vadd.f32 %v1807_v42, %v806_v38  ;;  %v1321_v39 = vpop.f32.mrb[43].mxu0 }
 0x2d9   : > { %v1454_v41 = vpop.eup %1453  ;;  %1459 = vtanh.f32 %v807_v37 }
 0x2da   : > { %v834_v43 = vmul.f32 2.0, %v1454_v41 }
 0x2db   : > { %v1456_v44 = vpop.eup %1455 }
 0x2dc   : > { %848 = vst [vmem:[%s1814_s30 + $0x50] sm:$0xff] %v834_v43  ;;  %v835_v45 = vmul.f32 2.0, %v1456_v44 }
 0x2de   : > { %849 = vst [vmem:[%s1814_s30 + $0x58] sm:$0xff] %v835_v45 }
 0x2e0   : > { %858 = sbr.rel (!%p1620_p4) target bundleno = 804 (0x324), region = 52 }
 0x2e1   : > { %v1458_v46 = vpop.eup %1457 }
 0x2e2   : > { %v836_v1 = vmul.f32 2.0, %v1458_v46 }
 0x2e3   : > { %v1460_v47 = vpop.eup %1459 }
 0x2e4   : > { %850 = vst [vmem:[%s1814_s30 + $0x60] sm:$0xff] %v836_v1  ;;  %v837_v40 = vmul.f32 2.0, %v1460_v47 }
 0x2e6   : > { %851 = vst [vmem:[%s1814_s30 + $0x68] sm:$0xff] %v837_v40 }
 0x2e7   : > { %s1947_s24 = smov (!%p861_p8, %s860_s24), 14 }
 0x2e8   : > { %s1153_s15 = sshll.u32 %s1947_s24, 7 }
 0x2e9   : > { %p1156_p9 = scmp.eq.s32.totalorder %s1153_s15, 0 }
 0x2ea   : > { %1461 = sdivrem.u32 (!%p1156_p9), %s1947_s24, 14 }
 0x2eb   : > { %869 = sbr.rel (%p1156_p9) target bundleno = 804 (0x324), region = 56 }
 0x2f3   : > { %s1853_s9 = spop.drf %1461 }
 0x2f4   : > { %p1157_p10 = scmp.le.s32.totalorder %s1853_s9, 0 }
 0x2f5   : > { %s1940_s27 = smov (!%p1157_p10), %s1847_s14  ;;  %s1941_s12 = smov (!%p1157_p10), %s1814_s30 }
 0x2f6   : > { %1077 = sbr.rel (%p1157_p10) target bundleno = 775 (0x307), region = 132  ;;  %s1862_s16 = smov (!%p1157_p10), 0  }
 0x2f7   : > { %s1864_s17 = smov (!%p1157_p10), 0  }
 0x2fd LB: >> { %v959_v42 = vld [vmem:[%s1527_s12] sm:$0xff]  ;;  %v961_v48 = vld [vmem:[%s1527_s12 + $0x8] sm:$0xff]  ;;  %v963_v49 = vld [vmem:[%s1527_s12 + $0x10] sm:$0xff]  ;;  %s987_s18 = sadd.s32 1, %s1531_s16  ;;  %s953_s17 = sadd.s32 1, %s1535_s17   ;;  %s1535_s17 = sphi %s1864_s17, %s953_s17   ;;  %s1531_s16 = sphi %s1862_s16, %s1942_s16   ;;  %s1527_s12 = sphi %s1941_s12, %s992_s12   ;;  %s1523_s27 = sphi %s1940_s27, %s993_s27  }
 0x2fe   : >> { %960 = vst [vmem:[%s1523_s27] sm:$0xff] %v959_v42  ;;  %962 = vst [vmem:[%s1523_s27 + $0x8] sm:$0xff] %v961_v48  ;;  %v965_v50 = vld [vmem:[%s1527_s12 + $0x18] sm:$0xff]  ;;  %v967_v51 = vld [vmem:[%s1527_s12 + $0x20] sm:$0xff]  ;;  %p988_p11 = scmp.ge.s32.totalorder %s987_s18, %s1853_s9  ;;  %p952_p12 = scmp.ge.s32.totalorder %s953_s17, %s1853_s9 }
 0x2ff   : >> { %964 = vst [vmem:[%s1523_s27 + $0x10] sm:$0xff] %v963_v49  ;;  %v969_v52 = vld [vmem:[%s1527_s12 + $0x28] sm:$0xff]  ;;  %966 = vst [vmem:[%s1523_s27 + $0x18] sm:$0xff] %v965_v50  ;;  %v971_v53 = vld [vmem:[%s1527_s12 + $0x30] sm:$0xff] }
 0x300   : >> { %968 = vst [vmem:[%s1523_s27 + $0x20] sm:$0xff] %v967_v51  ;;  %970 = vst [vmem:[%s1523_s27 + $0x28] sm:$0xff] %v969_v52  ;;  %v973_v54 = vld [vmem:[%s1527_s12 + $0x38] sm:$0xff]  ;;  %v975_v55 = vld [vmem:[%s1527_s12 + $0x40] sm:$0xff]  ;;  %s1949_s18 = smov (%p988_p11, %s987_s18), 0  ;;  %955 = sbr.rel (!%p952_p12) target bundleno = 765 (0x2fd), region = 138 }
 0x301   : >> { %972 = vst [vmem:[%s1523_s27 + $0x30] sm:$0xff] %v971_v53  ;;  %974 = vst [vmem:[%s1523_s27 + $0x38] sm:$0xff] %v973_v54  ;;  %v977_v56 = vld [vmem:[%s1527_s12 + $0x48] sm:$0xff]  ;;  %v979_v57 = vld [vmem:[%s1527_s12 + $0x50] sm:$0xff]  ;;  %s990_s19 = smul.u32 112, %s1949_s18  ;;  %s1942_s16 = smov %s1949_s18 }
 0x302   : >> { %976 = vst [vmem:[%s1523_s27 + $0x40] sm:$0xff] %v975_v55  ;;  %v981_v58 = vld [vmem:[%s1527_s12 + $0x58] sm:$0xff]  ;;  %978 = vst [vmem:[%s1523_s27 + $0x48] sm:$0xff] %v977_v56  ;;  %v983_v59 = vld [vmem:[%s1527_s12 + $0x60] sm:$0xff] }
 0x303   : >> { %980 = vst [vmem:[%s1523_s27 + $0x50] sm:$0xff] %v979_v57  ;;  %982 = vst [vmem:[%s1523_s27 + $0x58] sm:$0xff] %v981_v58  ;;  %v985_v60 = vld [vmem:[%s1527_s12 + $0x68] sm:$0xff]  ;;  %s992_s12 = scalar_lea.vmem %s1814_s30, %s990_s19 [#allocation2]  }
 0x304   : >> { %984 = vst [vmem:[%s1523_s27 + $0x60] sm:$0xff] %v983_v59  ;;  %986 = vst [vmem:[%s1523_s27 + $0x68] sm:$0xff] %v985_v60  ;;  %s993_s27 = scalar_lea.vmem %s1847_s14, %s990_s19  }
 0x307 PF: > { %1463 = sdivrem.u32 %s1947_s24, 14 }
 0x308   : > { %s1158_s20 = smul.u32 112, %s1853_s9 }
 0x30a   : > { %s998_s21 = scalar_lea.vmem %s1814_s30, %s1158_s20 [#allocation2]   ;;  %s1000_s22 = scalar_lea.vmem %s1847_s14, %s1158_s20  }
 0x310   : > { %s1464_s23 = spop.drf %1463 }
 0x311   : > { %p1160_p13 = scmp.le.s32.totalorder %s1464_s23, 0 }
 0x312   : > { %s1537_s26 = smov (!%p1160_p13), %s1000_s22   ;;  %s1541_s29 = smov (!%p1160_p13), %s998_s21  }
 0x313   : > { %1091 = sbr.rel (%p1160_p13) target bundleno = 804 (0x324), region = 143  ;;  %s1545_s10 = smov (!%p1160_p13), 0  }
 0x314   : > { %s1549_s11 = smov (!%p1160_p13), 0  }
 0x31a LB: >> { %v1010_v61 = vld [vmem:[%s1543_s29] sm:$0xff]  ;;  %s1012_s13 = sadd.s32 1, %s1547_s10  ;;  %s1004_s11 = sadd.s32 1, %s1551_s11   ;;  %s1551_s11 = sphi %s1549_s11, %s1004_s11   ;;  %s1547_s10 = sphi %s1545_s10, %s1546_s10   ;;  %s1543_s29 = sphi %s1541_s29, %s1017_s29   ;;  %s1539_s26 = sphi %s1537_s26, %s1018_s26  }
 0x31b   : >> { %1011 = vst [vmem:[%s1539_s26] sm:$0xff] %v1010_v61  ;;  %p1013_p0 = scmp.ge.s32.totalorder %s1012_s13, %s1464_s23  ;;  %p1003_p1 = scmp.ge.s32.totalorder %s1004_s11, %s1464_s23 }
 0x31d   : >> { %s1951_s13 = smov (%p1013_p0, %s1012_s13), 0  ;;  %1006 = sbr.rel (!%p1003_p1) target bundleno = 794 (0x31a), region = 149 }
 0x31e   : >> { %s1161_s30 = sshll.u32 %s1951_s13, 3  ;;  %s1546_s10 = smov %s1951_s13  }
 0x31f   : >> { %s1017_s29 = scalar_lea.vmem %s998_s21, %s1161_s30 [#allocation2]   ;;  %s1018_s26 = scalar_lea.vmem %s1000_s22, %s1161_s30  }
 0x324 PF: > { %p14_p2 = scmp.ge.s32.totalorder %s1610_s28, 4   ;;  %s1943_s24 = smov %s1515_s25 }
 0x325   : > { %s1944_s25 = smov %s1618_s8  ;;  %s1945_s26 = smov %s1610_s28 }
 0x326   :  { %16 = sbr.rel (!%p14_p2) target bundleno = 2 (0x2), region = 160 }

</bundles_post_ra>
